<compile_context>
chip_gen: v5e
topology: v5e:2x2
jax: 0.10.0
libtpu: 0.0.40
codegen_flags: <defaults>
</compile_context>

<pallas_src>
import functools

import jax
import jax.numpy as jnp
from jax.experimental import pallas as pl
from jax.experimental.pallas import tpu as pltpu


def _round_up8(n):
    return (n + 7) // 8 * 8


def _matchnet_kernel(q_ref, w_ref, st_ref, out_ref, *,
                     input_dim, support_size, process_step,
                     off_in, off_h, off_r, off_b):
    D = input_dim
    H = 2 * D                 # LSTM hidden width
    S = support_size

    q = q_ref[...]                               # (B, D)
    w_in = w_ref[off_in:off_in + D, :]           # (D, 8D)  W_ih.T          (g-cols x2)
    w_h = w_ref[off_h:off_h + H, :]              # (H, 8D)  [W_hh.T[:D]; 0] (g-cols x2)
    w_r = w_ref[off_r:off_r + S, :]              # (S, 8D)  S @ W_hh.T[D:]  (g-cols x2)
    bias = w_ref[off_b:off_b + 1, :]             # (1, 8D)  b_ih + b_hh     (g-cols x2)
    st = st_ref[...]                             # (H, S)   [support.T; 0]

    # Loop-invariant bases: computed once, off the per-step serial chain.
    gates_q = jnp.dot(q, w_in, preferred_element_type=jnp.float32) + bias       # (B, 8D)
    gates_base = gates_q + jnp.dot(q, w_h[:D, :],
                                   preferred_element_type=jnp.float32)          # (B, 8D)
    logits_q = jnp.dot(q, st[:D, :], preferred_element_type=jnp.float32)        # (B, S)

    c = None
    h_full = None
    attn = None
    logits = None

    # process_step is tiny (4) -> static unroll.
    for step in range(process_step):
        if step == 0:
            # Peeled first iteration: h_r == 0, the recurrent terms vanish.
            gates = gates_q
        else:
            gates = (gates_base
                     + jnp.dot(h_full, w_h, preferred_element_type=jnp.float32)
                     + jnp.dot(attn, w_r, preferred_element_type=jnp.float32))

        # One EUP pass over the whole gate block; the g gate's pre-activation
        # columns were pre-scaled by 2, so tanh(x) == 2*sigmoid(2x) - 1.
        sig = jax.nn.sigmoid(gates)
        i_g = sig[:, 0:H]
        g_g = 2.0 * sig[:, 2 * H:3 * H] - 1.0
        o_g = sig[:, 3 * H:4 * H]
        if step == 0:
            c = i_g * g_g                         # c starts at zero
        else:
            f_g = sig[:, H:2 * H]
            c = f_g * c + i_g * g_g
        h_full = o_g * jnp.tanh(c)                # (B, H)

        # logits == (q + h_full[:, :D]) @ support.T  (zero-padded support.T
        # lets h_full feed the dot directly; the q part is logits_q).
        logits = logits_q + jnp.dot(h_full, st, preferred_element_type=jnp.float32)

        if step < process_step - 1:
            # The last iteration's attn / r are dead in the original module.
            m = jnp.max(logits, axis=1, keepdims=True)
            p = jnp.exp(logits - m)
            attn = p / jnp.sum(p, axis=1, keepdims=True)   # exact reciprocal

    # matching_scores == last iteration's logits.
    out_ref[...] = logits


def make_matchnet(support_mean, w_ih, w_hh, b_ih, b_hh, *, process_step=4):
    """One-time (per episode / model) parameter prep.

    Returns a jitted forward(query_mean) whose per-call graph is just the
    pallas_call (+ squeeze).  Cache the returned closure and reuse it for
    every query batch of the episode.
    """
    assert process_step >= 1, "process_step must be >= 1"
    S, D = support_mean.shape
    H = 2 * D
    G = 4 * H

    s = jnp.asarray(support_mean, jnp.float32)                        # (S, D)
    w_ih = jnp.asarray(w_ih, jnp.float32)                             # (4H, D)
    w_hh = jnp.asarray(w_hh, jnp.float32)                             # (4H, H)
    bias = jnp.asarray(b_ih, jnp.float32) + jnp.asarray(b_hh, jnp.float32)  # (4H,)

    # Pre-scale the g-gate columns by 2: tanh(x) == 2*sigmoid(2x) - 1 lets the
    # kernel use a single sigmoid pass over the whole gate block.
    g_scale = jnp.ones((G,), jnp.float32).at[2 * H:3 * H].set(2.0)

    whh_t = w_hh.T                                                    # (H, G)
    w_in = w_ih.T * g_scale                                           # (D, G) acts on q
    w_hh_h = whh_t[:D] * g_scale                                      # (D, G) acts on h
    w_r = (s @ whh_t[D:]) * g_scale                                   # (S, G) acts on attn
    b_row = (bias * g_scale).reshape(1, G)                            # (1, G)

    # Pack all (., G) operands into one VMEM array; every section starts on an
    # 8-row sublane boundary so in-kernel static slices stay aligned.  The
    # rows D:H of the W_hh_h section stay zero (that is the h_full padding).
    off_in = 0
    off_h = _round_up8(off_in + D)
    off_r = _round_up8(off_h + H)
    off_b = _round_up8(off_r + S)
    total = _round_up8(off_b + 1)
    w_cat = jnp.zeros((total, G), jnp.float32)
    w_cat = w_cat.at[off_in:off_in + D].set(w_in)
    w_cat = w_cat.at[off_h:off_h + D].set(w_hh_h)
    w_cat = w_cat.at[off_r:off_r + S].set(w_r)
    w_cat = w_cat.at[off_b:off_b + 1].set(b_row)

    # support.T zero-padded to (H, S) so h_full feeds the logits dot directly.
    st_pad = jnp.zeros((H, S), jnp.float32).at[:D].set(s.T)

    kernel = functools.partial(
        _matchnet_kernel, input_dim=D, support_size=S,
        process_step=process_step,
        off_in=off_in, off_h=off_h, off_r=off_r, off_b=off_b)
    vmem = pl.BlockSpec(memory_space=pltpu.MemorySpace.VMEM)

    # TODO(synk): batch episodes onto a leading "parallel" grid axis (with a
    # lane-dense output layout) to use both TensorCores on v7x and amortize
    # per-call overhead; a single grid-less call runs on one TC.

    @jax.jit
    def _forward(query_mean, w_cat_, st_pad_):
        B = query_mean.shape[0]
        scores = pl.pallas_call(
            kernel,
            out_shape=jax.ShapeDtypeStruct((B, S), jnp.float32),
            in_specs=[vmem, vmem, vmem],
            out_specs=vmem,
        )(query_mean.astype(jnp.float32), w_cat_, st_pad_)
        # torch .squeeze(): drop size-1 dims (no-op for B, S > 1)
        return jnp.squeeze(scores)

    def forward(query_mean):
        return _forward(query_mean, w_cat, st_pad)

    return forward


def matchnet_forward(support_mean, support_var, query_mean, query_var,
                     w_ih, w_hh, b_ih, b_hh, *, process_step=4):
    """Drop-in equivalent of MatchNet.forward (support_var/query_var unused by
    the original forward).  For repeated calls, cache make_matchnet() per
    episode/model instead of calling this convenience wrapper every time."""
    del support_var, query_var
    fwd = make_matchnet(support_mean, w_ih, w_hh, b_ih, b_hh,
                        process_step=process_step)
    return fwd(query_mean)


def _reference_forward(support_mean, query_mean, w_ih, w_hh, b_ih, b_hh,
                       process_step=4):
    """Pure-JAX reference mirroring the PyTorch module (exact math)."""
    B, D = query_mean.shape
    H = 2 * D
    h_r = jnp.zeros((B, H), jnp.float32)
    c = jnp.zeros((B, H), jnp.float32)
    h = query_mean
    for _ in range(process_step):
        gates = query_mean @ w_ih.T + h_r @ w_hh.T + b_ih + b_hh
        i_g = jax.nn.sigmoid(gates[:, 0:H])
        f_g = jax.nn.sigmoid(gates[:, H:2 * H])
        g_g = jnp.tanh(gates[:, 2 * H:3 * H])
        o_g = jax.nn.sigmoid(gates[:, 3 * H:4 * H])
        c = f_g * c + i_g * g_g
        h_full = o_g * jnp.tanh(c)
        h = query_mean + h_full[:, :D]
        attn = jax.nn.softmax(h @ support_mean.T, axis=1)
        r = attn @ support_mean
        h_r = jnp.concatenate([h, r], axis=1)
    return jnp.squeeze(h @ support_mean.T)


if __name__ == "__main__":
    # Small shapes: D (input_dim) = 32, support set S = 8, query batch B = 2.
    B, S, D = 2, 8, 32
    H = 2 * D
    process_step = 4

    key = jax.random.PRNGKey(0)
    k_sm, k_sv, k_qm, k_qv, k_wih, k_whh, k_bih, k_bhh = jax.random.split(key, 8)

    support_mean = jax.random.normal(k_sm, (S, D), jnp.float32)
    support_var = jax.random.normal(k_sv, (S, D), jnp.float32)   # unused by forward
    query_mean = jax.random.normal(k_qm, (B, D), jnp.float32)
    query_var = jax.random.normal(k_qv, (B, D), jnp.float32)     # unused by forward

    # PyTorch LSTMCell init: uniform(-1/sqrt(hidden), 1/sqrt(hidden))
    stdv = 1.0 / (H ** 0.5)
    w_ih = jax.random.uniform(k_wih, (4 * H, D), jnp.float32, -stdv, stdv)
    w_hh = jax.random.uniform(k_whh, (4 * H, H), jnp.float32, -stdv, stdv)
    b_ih = jax.random.uniform(k_bih, (4 * H,), jnp.float32, -stdv, stdv)
    b_hh = jax.random.uniform(k_bhh, (4 * H,), jnp.float32, -stdv, stdv)

    # Cached path: prep once, then the per-call graph is just the pallas_call.
    fwd = make_matchnet(support_mean, w_ih, w_hh, b_ih, b_hh,
                        process_step=process_step)
    scores = jax.block_until_ready(fwd(query_mean))

    # Also exercise the drop-in signature once.
    scores2 = jax.block_until_ready(
        matchnet_forward(support_mean, support_var, query_mean, query_var,
                         w_ih, w_hh, b_ih, b_hh, process_step=process_step))

    ref = _reference_forward(support_mean, query_mean, w_ih, w_hh, b_ih, b_hh,
                             process_step=process_step)
    assert scores.shape == (B, S)
    assert jnp.allclose(scores, ref, atol=1e-3, rtol=1e-3), \
        f"max abs diff {jnp.max(jnp.abs(scores - ref))}"
    assert jnp.allclose(scores2, ref, atol=1e-3, rtol=1e-3)

    print("KERNEL_OK")
</pallas_src>

<mosaic_0001>
module attributes {stable_mosaic.version = 11 : i64} {
  func.func @_matchnet_kernel(%arg0: memref<2x32xf32, #tpu.memory_space<vmem>>, %arg1: memref<112x256xf32, #tpu.memory_space<vmem>>, %arg2: memref<64x8xf32, #tpu.memory_space<vmem>>, %arg3: memref<2x8xf32, #tpu.memory_space<vmem>>) attributes {dimension_semantics = [], scalar_prefetch = 0 : i64, scratch_operands = 0 : i64, tpu.core_type = #tpu.core_type<tc>} {
    %c0 = arith.constant 0 : index
    %c0_0 = arith.constant 0 : index
    %0 = vector.load %arg0[%c0, %c0_0] : memref<2x32xf32, #tpu.memory_space<vmem>>, vector<2x32xf32>
    %c0_1 = arith.constant 0 : index
    %c0_2 = arith.constant 0 : index
    %1 = vector.load %arg1[%c0_1, %c0_2] : memref<112x256xf32, #tpu.memory_space<vmem>>, vector<32x256xf32>
    %c32 = arith.constant 32 : index
    %c0_3 = arith.constant 0 : index
    %2 = vector.load %arg1[%c32, %c0_3] : memref<112x256xf32, #tpu.memory_space<vmem>>, vector<64x256xf32>
    %c96 = arith.constant 96 : index
    %c0_4 = arith.constant 0 : index
    %3 = vector.load %arg1[%c96, %c0_4] : memref<112x256xf32, #tpu.memory_space<vmem>>, vector<8x256xf32>
    %c104 = arith.constant 104 : index
    %c0_5 = arith.constant 0 : index
    %4 = vector.load %arg1[%c104, %c0_5] : memref<112x256xf32, #tpu.memory_space<vmem>>, vector<1x256xf32>
    %c0_6 = arith.constant 0 : index
    %c0_7 = arith.constant 0 : index
    %5 = vector.load %arg2[%c0_6, %c0_7] : memref<64x8xf32, #tpu.memory_space<vmem>>, vector<64x8xf32>
    %cst = arith.constant dense<0.000000e+00> : vector<2x256xf32>
    %6 = tpu.matmul %0, %1, %cst {dimension_numbers = #tpu.dot_dimension_numbers<[1], [0], [0], [1], [0, 0, 1, 1], [], []>} : vector<2x32xf32>, vector<32x256xf32>, vector<2x256xf32> -> vector<2x256xf32>
    %7 = vector.broadcast %4 : vector<1x256xf32> to vector<2x256xf32>
    %8 = arith.addf %6, %7 : vector<2x256xf32>
    %9 = vector.extract_strided_slice %2 {offsets = [0, 0], sizes = [32, 256], strides = [1, 1]} : vector<64x256xf32> to vector<32x256xf32>
    %cst_8 = arith.constant dense<0.000000e+00> : vector<2x256xf32>
    %10 = tpu.matmul %0, %9, %cst_8 {dimension_numbers = #tpu.dot_dimension_numbers<[1], [0], [0], [1], [0, 0, 1, 1], [], []>} : vector<2x32xf32>, vector<32x256xf32>, vector<2x256xf32> -> vector<2x256xf32>
    %11 = arith.addf %8, %10 : vector<2x256xf32>
    %12 = vector.extract_strided_slice %5 {offsets = [0, 0], sizes = [32, 8], strides = [1, 1]} : vector<64x8xf32> to vector<32x8xf32>
    %cst_9 = arith.constant dense<0.000000e+00> : vector<2x8xf32>
    %13 = tpu.matmul %0, %12, %cst_9 {dimension_numbers = #tpu.dot_dimension_numbers<[1], [0], [0], [1], [0, 0, 1, 1], [], []>} : vector<2x32xf32>, vector<32x8xf32>, vector<2x8xf32> -> vector<2x8xf32>
    %14 = arith.negf %8 : vector<2x256xf32>
    %15 = math.exp %14 : vector<2x256xf32>
    %cst_10 = arith.constant 1.000000e+00 : f32
    %16 = vector.broadcast %cst_10 : f32 to vector<2x256xf32>
    %17 = arith.addf %16, %15 : vector<2x256xf32>
    %18 = arith.divf %16, %17 : vector<2x256xf32>
    %19 = vector.extract_strided_slice %18 {offsets = [0, 0], sizes = [2, 64], strides = [1, 1]} : vector<2x256xf32> to vector<2x64xf32>
    %20 = vector.extract_strided_slice %18 {offsets = [0, 128], sizes = [2, 64], strides = [1, 1]} : vector<2x256xf32> to vector<2x64xf32>
    %cst_11 = arith.constant 2.000000e+00 : f32
    %21 = vector.broadcast %cst_11 : f32 to vector<2x64xf32>
    %22 = arith.mulf %21, %20 : vector<2x64xf32>
    %cst_12 = arith.constant 1.000000e+00 : f32
    %23 = vector.broadcast %cst_12 : f32 to vector<2x64xf32>
    %24 = arith.subf %22, %23 : vector<2x64xf32>
    %25 = vector.extract_strided_slice %18 {offsets = [0, 192], sizes = [2, 64], strides = [1, 1]} : vector<2x256xf32> to vector<2x64xf32>
    %26 = arith.mulf %19, %24 : vector<2x64xf32>
    %27 = math.tanh %26 : vector<2x64xf32>
    %28 = arith.mulf %25, %27 : vector<2x64xf32>
    %cst_13 = arith.constant dense<0.000000e+00> : vector<2x8xf32>
    %29 = tpu.matmul %28, %5, %cst_13 {dimension_numbers = #tpu.dot_dimension_numbers<[1], [0], [0], [1], [0, 0, 1, 1], [], []>} : vector<2x64xf32>, vector<64x8xf32>, vector<2x8xf32> -> vector<2x8xf32>
    %30 = arith.addf %13, %29 : vector<2x8xf32>
    %cst_14 = arith.constant dense<0xFF800000> : vector<2xf32>
    %31 = vector.multi_reduction <maximumf>, %30, %cst_14 [1] : vector<2x8xf32> to vector<2xf32>
    %32 = vector.shape_cast %31 : vector<2xf32> to vector<2x1xf32>
    %33 = vector.broadcast %32 : vector<2x1xf32> to vector<2x8xf32>
    %34 = arith.subf %30, %33 : vector<2x8xf32>
    %35 = math.exp %34 : vector<2x8xf32>
    %cst_15 = arith.constant dense<0.000000e+00> : vector<2xf32>
    %36 = vector.multi_reduction <add>, %35, %cst_15 [1] : vector<2x8xf32> to vector<2xf32>
    %37 = vector.shape_cast %36 : vector<2xf32> to vector<2x1xf32>
    %38 = vector.broadcast %37 : vector<2x1xf32> to vector<2x8xf32>
    %39 = arith.divf %35, %38 : vector<2x8xf32>
    %cst_16 = arith.constant dense<0.000000e+00> : vector<2x256xf32>
    %40 = tpu.matmul %28, %2, %cst_16 {dimension_numbers = #tpu.dot_dimension_numbers<[1], [0], [0], [1], [0, 0, 1, 1], [], []>} : vector<2x64xf32>, vector<64x256xf32>, vector<2x256xf32> -> vector<2x256xf32>
    %41 = arith.addf %11, %40 : vector<2x256xf32>
    %cst_17 = arith.constant dense<0.000000e+00> : vector<2x256xf32>
    %42 = tpu.matmul %39, %3, %cst_17 {dimension_numbers = #tpu.dot_dimension_numbers<[1], [0], [0], [1], [0, 0, 1, 1], [], []>} : vector<2x8xf32>, vector<8x256xf32>, vector<2x256xf32> -> vector<2x256xf32>
    %43 = arith.addf %41, %42 : vector<2x256xf32>
    %44 = arith.negf %43 : vector<2x256xf32>
    %45 = math.exp %44 : vector<2x256xf32>
    %cst_18 = arith.constant 1.000000e+00 : f32
    %46 = vector.broadcast %cst_18 : f32 to vector<2x256xf32>
    %47 = arith.addf %46, %45 : vector<2x256xf32>
    %48 = arith.divf %46, %47 : vector<2x256xf32>
    %49 = vector.extract_strided_slice %48 {offsets = [0, 0], sizes = [2, 64], strides = [1, 1]} : vector<2x256xf32> to vector<2x64xf32>
    %50 = vector.extract_strided_slice %48 {offsets = [0, 128], sizes = [2, 64], strides = [1, 1]} : vector<2x256xf32> to vector<2x64xf32>
    %cst_19 = arith.constant 2.000000e+00 : f32
    %51 = vector.broadcast %cst_19 : f32 to vector<2x64xf32>
    %52 = arith.mulf %51, %50 : vector<2x64xf32>
    %cst_20 = arith.constant 1.000000e+00 : f32
    %53 = vector.broadcast %cst_20 : f32 to vector<2x64xf32>
    %54 = arith.subf %52, %53 : vector<2x64xf32>
    %55 = vector.extract_strided_slice %48 {offsets = [0, 192], sizes = [2, 64], strides = [1, 1]} : vector<2x256xf32> to vector<2x64xf32>
    %56 = vector.extract_strided_slice %48 {offsets = [0, 64], sizes = [2, 64], strides = [1, 1]} : vector<2x256xf32> to vector<2x64xf32>
    %57 = arith.mulf %56, %26 : vector<2x64xf32>
    %58 = arith.mulf %49, %54 : vector<2x64xf32>
    %59 = arith.addf %57, %58 : vector<2x64xf32>
    %60 = math.tanh %59 : vector<2x64xf32>
    %61 = arith.mulf %55, %60 : vector<2x64xf32>
    %cst_21 = arith.constant dense<0.000000e+00> : vector<2x8xf32>
    %62 = tpu.matmul %61, %5, %cst_21 {dimension_numbers = #tpu.dot_dimension_numbers<[1], [0], [0], [1], [0, 0, 1, 1], [], []>} : vector<2x64xf32>, vector<64x8xf32>, vector<2x8xf32> -> vector<2x8xf32>
    %63 = arith.addf %13, %62 : vector<2x8xf32>
    %cst_22 = arith.constant dense<0xFF800000> : vector<2xf32>
    %64 = vector.multi_reduction <maximumf>, %63, %cst_22 [1] : vector<2x8xf32> to vector<2xf32>
    %65 = vector.shape_cast %64 : vector<2xf32> to vector<2x1xf32>
    %66 = vector.broadcast %65 : vector<2x1xf32> to vector<2x8xf32>
    %67 = arith.subf %63, %66 : vector<2x8xf32>
    %68 = math.exp %67 : vector<2x8xf32>
    %cst_23 = arith.constant dense<0.000000e+00> : vector<2xf32>
    %69 = vector.multi_reduction <add>, %68, %cst_23 [1] : vector<2x8xf32> to vector<2xf32>
    %70 = vector.shape_cast %69 : vector<2xf32> to vector<2x1xf32>
    %71 = vector.broadcast %70 : vector<2x1xf32> to vector<2x8xf32>
    %72 = arith.divf %68, %71 : vector<2x8xf32>
    %cst_24 = arith.constant dense<0.000000e+00> : vector<2x256xf32>
    %73 = tpu.matmul %61, %2, %cst_24 {dimension_numbers = #tpu.dot_dimension_numbers<[1], [0], [0], [1], [0, 0, 1, 1], [], []>} : vector<2x64xf32>, vector<64x256xf32>, vector<2x256xf32> -> vector<2x256xf32>
    %74 = arith.addf %11, %73 : vector<2x256xf32>
    %cst_25 = arith.constant dense<0.000000e+00> : vector<2x256xf32>
    %75 = tpu.matmul %72, %3, %cst_25 {dimension_numbers = #tpu.dot_dimension_numbers<[1], [0], [0], [1], [0, 0, 1, 1], [], []>} : vector<2x8xf32>, vector<8x256xf32>, vector<2x256xf32> -> vector<2x256xf32>
    %76 = arith.addf %74, %75 : vector<2x256xf32>
    %77 = arith.negf %76 : vector<2x256xf32>
    %78 = math.exp %77 : vector<2x256xf32>
    %cst_26 = arith.constant 1.000000e+00 : f32
    %79 = vector.broadcast %cst_26 : f32 to vector<2x256xf32>
    %80 = arith.addf %79, %78 : vector<2x256xf32>
    %81 = arith.divf %79, %80 : vector<2x256xf32>
    %82 = vector.extract_strided_slice %81 {offsets = [0, 0], sizes = [2, 64], strides = [1, 1]} : vector<2x256xf32> to vector<2x64xf32>
    %83 = vector.extract_strided_slice %81 {offsets = [0, 128], sizes = [2, 64], strides = [1, 1]} : vector<2x256xf32> to vector<2x64xf32>
    %cst_27 = arith.constant 2.000000e+00 : f32
    %84 = vector.broadcast %cst_27 : f32 to vector<2x64xf32>
    %85 = arith.mulf %84, %83 : vector<2x64xf32>
    %cst_28 = arith.constant 1.000000e+00 : f32
    %86 = vector.broadcast %cst_28 : f32 to vector<2x64xf32>
    %87 = arith.subf %85, %86 : vector<2x64xf32>
    %88 = vector.extract_strided_slice %81 {offsets = [0, 192], sizes = [2, 64], strides = [1, 1]} : vector<2x256xf32> to vector<2x64xf32>
    %89 = vector.extract_strided_slice %81 {offsets = [0, 64], sizes = [2, 64], strides = [1, 1]} : vector<2x256xf32> to vector<2x64xf32>
    %90 = arith.mulf %89, %59 : vector<2x64xf32>
    %91 = arith.mulf %82, %87 : vector<2x64xf32>
    %92 = arith.addf %90, %91 : vector<2x64xf32>
    %93 = math.tanh %92 : vector<2x64xf32>
    %94 = arith.mulf %88, %93 : vector<2x64xf32>
    %cst_29 = arith.constant dense<0.000000e+00> : vector<2x8xf32>
    %95 = tpu.matmul %94, %5, %cst_29 {dimension_numbers = #tpu.dot_dimension_numbers<[1], [0], [0], [1], [0, 0, 1, 1], [], []>} : vector<2x64xf32>, vector<64x8xf32>, vector<2x8xf32> -> vector<2x8xf32>
    %96 = arith.addf %13, %95 : vector<2x8xf32>
    %cst_30 = arith.constant dense<0xFF800000> : vector<2xf32>
    %97 = vector.multi_reduction <maximumf>, %96, %cst_30 [1] : vector<2x8xf32> to vector<2xf32>
    %98 = vector.shape_cast %97 : vector<2xf32> to vector<2x1xf32>
    %99 = vector.broadcast %98 : vector<2x1xf32> to vector<2x8xf32>
    %100 = arith.subf %96, %99 : vector<2x8xf32>
    %101 = math.exp %100 : vector<2x8xf32>
    %cst_31 = arith.constant dense<0.000000e+00> : vector<2xf32>
    %102 = vector.multi_reduction <add>, %101, %cst_31 [1] : vector<2x8xf32> to vector<2xf32>
    %103 = vector.shape_cast %102 : vector<2xf32> to vector<2x1xf32>
    %104 = vector.broadcast %103 : vector<2x1xf32> to vector<2x8xf32>
    %105 = arith.divf %101, %104 : vector<2x8xf32>
    %cst_32 = arith.constant dense<0.000000e+00> : vector<2x256xf32>
    %106 = tpu.matmul %94, %2, %cst_32 {dimension_numbers = #tpu.dot_dimension_numbers<[1], [0], [0], [1], [0, 0, 1, 1], [], []>} : vector<2x64xf32>, vector<64x256xf32>, vector<2x256xf32> -> vector<2x256xf32>
    %107 = arith.addf %11, %106 : vector<2x256xf32>
    %cst_33 = arith.constant dense<0.000000e+00> : vector<2x256xf32>
    %108 = tpu.matmul %105, %3, %cst_33 {dimension_numbers = #tpu.dot_dimension_numbers<[1], [0], [0], [1], [0, 0, 1, 1], [], []>} : vector<2x8xf32>, vector<8x256xf32>, vector<2x256xf32> -> vector<2x256xf32>
    %109 = arith.addf %107, %108 : vector<2x256xf32>
    %110 = arith.negf %109 : vector<2x256xf32>
    %111 = math.exp %110 : vector<2x256xf32>
    %cst_34 = arith.constant 1.000000e+00 : f32
    %112 = vector.broadcast %cst_34 : f32 to vector<2x256xf32>
    %113 = arith.addf %112, %111 : vector<2x256xf32>
    %114 = arith.divf %112, %113 : vector<2x256xf32>
    %115 = vector.extract_strided_slice %114 {offsets = [0, 0], sizes = [2, 64], strides = [1, 1]} : vector<2x256xf32> to vector<2x64xf32>
    %116 = vector.extract_strided_slice %114 {offsets = [0, 128], sizes = [2, 64], strides = [1, 1]} : vector<2x256xf32> to vector<2x64xf32>
    %cst_35 = arith.constant 2.000000e+00 : f32
    %117 = vector.broadcast %cst_35 : f32 to vector<2x64xf32>
    %118 = arith.mulf %117, %116 : vector<2x64xf32>
    %cst_36 = arith.constant 1.000000e+00 : f32
    %119 = vector.broadcast %cst_36 : f32 to vector<2x64xf32>
    %120 = arith.subf %118, %119 : vector<2x64xf32>
    %121 = vector.extract_strided_slice %114 {offsets = [0, 192], sizes = [2, 64], strides = [1, 1]} : vector<2x256xf32> to vector<2x64xf32>
    %122 = vector.extract_strided_slice %114 {offsets = [0, 64], sizes = [2, 64], strides = [1, 1]} : vector<2x256xf32> to vector<2x64xf32>
    %123 = arith.mulf %122, %92 : vector<2x64xf32>
    %124 = arith.mulf %115, %120 : vector<2x64xf32>
    %125 = arith.addf %123, %124 : vector<2x64xf32>
    %126 = math.tanh %125 : vector<2x64xf32>
    %127 = arith.mulf %121, %126 : vector<2x64xf32>
    %cst_37 = arith.constant dense<0.000000e+00> : vector<2x8xf32>
    %128 = tpu.matmul %127, %5, %cst_37 {dimension_numbers = #tpu.dot_dimension_numbers<[1], [0], [0], [1], [0, 0, 1, 1], [], []>} : vector<2x64xf32>, vector<64x8xf32>, vector<2x8xf32> -> vector<2x8xf32>
    %129 = arith.addf %13, %128 : vector<2x8xf32>
    %c0_38 = arith.constant 0 : index
    %c0_39 = arith.constant 0 : index
    %130 = vector.load %arg3[%c0_38, %c0_39] : memref<2x8xf32, #tpu.memory_space<vmem>>, vector<2x8xf32>
    tpu.vector_store %arg3[%c0_38, %c0_39], %129 {strides = array<i32>} : memref<2x8xf32, #tpu.memory_space<vmem>>, vector<2x8xf32>,
    return
  }
}

</mosaic_0001>

<bundles_post_ra>
// kernel: _forward.1
= control target key start
LH: loop header
LB: loop body
LE: loop exit
PB: predicated region body
PF: predicated region fallthrough
CT: control target
= control target key end

     0   :  { %8 = vsyncpa [#allocation3], 0  ;;  %s1265_s0 = inlined_call_operand.vmem [shape: f32[2,32], index: 0, kind: input, shape index: {}]   ;;  %s1266_s1 = inlined_call_operand.hbm [shape: f32[112,256], index: 1, kind: input, shape index: {}]   ;;  %s1267_s2 = inlined_call_operand.vmem [shape: f32[64,8], index: 2, kind: input, shape index: {}]   ;;  %s1268_s3 = inlined_call_operand.hbm [shape: f32[2,8], index: 3, kind: output, shape index: {}]  }
   0x1   :  { %9 = vsyncpa [#allocation4], 0  ;;  %s16_s14 = sshll.u32 %s1266_s1, 4  ;;  %s977_s15 = smov [#allocation2]   ;;  %s17_s14 = int_to_ptr.hbm [resolvable:$true] %s16_s14 }
   0x2   :  { %s18_s16 = sshll.u32 %s977_s15, 4  ;;  %s978_s17 = smov 256   ;;  %s19_s16 = int_to_ptr.vmem [resolvable:$true] %s18_s16 }
   0x3   :  { %s979_s18 = smov 16  }
   0x4   :  { %24 = dma.hbm_to_vmem [thread:$0]  %s17_s14, 3584, %s19_s16, [#allocation3], %s978_s17, %s978_s17, %s979_s18  }
   0x5   :  { %973 = dma.done.wait [#allocation3], 3584  }
   0x6   :  { %974 = vsyncadd [#allocation3], 4294963712  ;;  %v38_v0 = vld [vmem:[#allocation2 + $0x30] sm:$0xff]  ;;  %v39_v1 = vld [vmem:[#allocation2 + $0x38] sm:$0xff]  ;;  %vm73_vm0 = vcmask 261120   ;;  %vm229_vm9 = vcmask 523264  }
   0x7   :  { %v36_v2 = vld [vmem:[#allocation2 + $0x20] sm:$0xff]  ;;  %89 = vmatpush.msra.mxu0 %v38_v0  ;;  %109 = vmatpush.msra.mxu2 %v39_v1  ;;  %v37_v3 = vld [vmem:[#allocation2 + $0x28] sm:$0xff]  ;;  %v1005_v4 = vld [vmem:[#allocation2 + $0x78] sm:$0xff]  ;;  %vm253_vm10 = vcmask 58368   ;;  %vm320_vm15 = vcmask 64512   ;;  %s825_s12 = sshll.u32 %s1268_s3, 4  ;;  %s826_s12 = int_to_ptr.hbm [resolvable:$true] %s825_s12 }
   0x8   :  { %149 = vmatpush.msra.mxu3 %v1005_v4  ;;  %v34_v5 = vld [vmem:[#allocation2 + $0x10] sm:$0xff]  ;;  %v35_v6 = vld [vmem:[#allocation2 + $0x18] sm:$0xff]  ;;  %v1008_v7 = vld [vmem:[#allocation2 + $0x68] sm:$0xff] }
   0x9   :  { %90 = vmatpush.msra.mxu0 %v36_v2  ;;  %110 = vmatpush.msra.mxu2 %v37_v3  ;;  %v1010_v8 = vld [vmem:[#allocation2 + $0x58] sm:$0xff]  ;;  %v32_v9 = vld [vmem:[#allocation2] sm:$0xff]  ;;  %v33_v10 = vld [vmem:[#allocation2 + $0x8] sm:$0xff] }
   0xa   :  { %150 = vmatpush.msra.mxu3 %v1008_v7  ;;  %v1016_v11 = vld [vmem:[%s1265_s0] sm:$0x3]  ;;  %v1019_v12 = vld [vmem:[#allocation2 + $0x70] sm:$0xff]  ;;  %v1021_v13 = vld [vmem:[#allocation2 + $0x48] sm:$0xff]  ;;  %s980_s0 = smov 64  }
   0xb   :  { %91 = vmatpush.msra.mxu0 %v34_v5  ;;  %111 = vmatpush.msra.mxu2 %v35_v6  ;;  %v1027_v14 = vld [vmem:[#allocation2 + $0x60] sm:$0xff]  ;;  %v1033_v15 = vld [vmem:[#allocation2 + $0x50] sm:$0xff]  ;;  %v1056_v54 = vld [vmem:[%s1267_s2 + $0x38] sm:$0xff] }
   0xc   :  { %151 = vmatpush.msra.mxu3 %v1010_v8  ;;  %v1036_v16 = vld [vmem:[#allocation2 + $0x40] sm:$0xff]  ;;  %v59_v17 = vld [vmem:[#allocation2 + $0xd0] ss:$8 sm:$0x3]  ;;  %240 = vmatpush.msra.mxu1 %v1056_v54  ;;  %v1071_v59 = vld [vmem:[#allocation2 + $0xa8] sm:$0xff] }
   0xd   :  { %92 = vmatpush.msra.mxu0 %v32_v9  ;;  %112 = vmatpush.msra.mxu2 %v33_v10  ;;  %v69_v18 = vperm.slane %v59_v17, 0  ;;  %v70_v22 = vperm.slane %v59_v17, 1  ;;  %v1058_v55 = vld [vmem:[#allocation2 + $0xb0] sm:$0xff]  ;;  %v1060_v56 = vld [vmem:[#allocation2 + $0xb8] sm:$0xff]  ;;  %v1069_v58 = vld [vmem:[#allocation2 + $0xa0] sm:$0xff] }
   0xe   :  { %835 = vmatmul.msk.f32.vlgmr.msra.gmra.mxu0 %vm73_vm0, %v1016_v11  ;;  %836 = vmatmul.msk.f32.vlgmr.msra.gmra.mxu2 %vm73_vm0, %v1016_v11  ;;  %v1067_v57 = vld [vmem:[%s1267_s2 + $0x30] sm:$0xff]  ;;  %v1077_v60 = vld [vmem:[%s1267_s2 + $0x28] sm:$0xff]  ;;  %v1083_v62 = vld [vmem:[#allocation2 + $0x98] sm:$0xff] }
   0xf   :  { %129 = vmatpush.msrb.mxu2 %v1019_v12  ;;  %152 = vmatpush.msra.mxu3 %v1021_v13  ;;  %v1079_v61 = vld [vmem:[#allocation2 + $0x90] sm:$0xff]  ;;  %v1089_v63 = vld [vmem:[%s1267_s2 + $0x20] sm:$0xff]  ;;  %v1096_v1 = vld [vmem:[%s1267_s2 + $0x18] sm:$0xff] }
  0x10   :  { %838 = vmatmul.msk.f32.vlgmr.msra.gmra.mxu3 %vm73_vm0, %v1016_v11  ;;  %241 = vmatpush.msra.mxu1 %v1067_v57  ;;  %v1091_v0 = vld [vmem:[#allocation2 + $0x80] sm:$0xff]  ;;  %v1100_v2 = vld [vmem:[#allocation2 + $0x88] sm:$0xff]  ;;  %v1105_v3 = vld [vmem:[%s1267_s2 + $0x10] sm:$0xff] }
  0x11   :  { %130 = vmatpush.msrb.mxu2 %v1027_v14  ;;  %306 = vmatpush.msrb.mxu3 %v1060_v56  ;;  %v1114_v5 = vld [vmem:[%s1267_s2 + $0x8] sm:$0xff]  ;;  %v1123_v6 = vld [vmem:[%s1267_s2] sm:$0xff]  ;;  %s981_s2 = smov [#allocation5]  }
  0x12   :  { %242 = vmatpush.msra.mxu1 %v1077_v60  ;;  %171 = vmatpush.msrb.mxu0 %v1096_v1  ;;  %s823_s9 = sshll.u32 %s981_s2, 4  ;;  %s824_s9 = int_to_ptr.vmem [resolvable:$true] %s823_s9 }
  0x13   :  { %131 = vmatpush.msrb.mxu2 %v1033_v15  ;;  %307 = vmatpush.msrb.mxu3 %v1071_v59 }
  0x14   :  { %243 = vmatpush.msra.mxu1 %v1089_v63  ;;  %172 = vmatpush.msrb.mxu0 %v1105_v3 }
  0x15   :  { %132 = vmatpush.msrb.mxu2 %v1036_v16  ;;  %308 = vmatpush.msrb.mxu3 %v1083_v62 }
  0x16   :  { %837 = vmatmul.msk.f32.vlgmr.msrb.gmra.mxu2 %vm73_vm0, %v1016_v11  ;;  %244 = vmatpush.msra.mxu1 %v1096_v1 }
  0x17   :  { %286 = vmatpush.msra.mxu2 %v1058_v55  ;;  %309 = vmatpush.msrb.mxu3 %v1100_v2 }
  0x18   :  { %173 = vmatpush.msrb.mxu0 %v1114_v5  ;;  %245 = vmatpush.msra.mxu1 %v1105_v3 }
  0x19   :  { %287 = vmatpush.msra.mxu2 %v1069_v58  ;;  %310 = vmatpush.msrb.mxu3 %v1005_v4 }
  0x1a   :  { %174 = vmatpush.msrb.mxu0 %v1123_v6  ;;  %246 = vmatpush.msra.mxu1 %v1114_v5 }
  0x1b   :  { %288 = vmatpush.msra.mxu2 %v1079_v61  ;;  %311 = vmatpush.msrb.mxu3 %v1008_v7 }
  0x1c   :  { %839 = vmatmul.msk.f32.vlgmr.msrb.gmra.mxu0 %vm73_vm0, %v1016_v11  ;;  %247 = vmatpush.msra.mxu1 %v1123_v6 }
  0x1d   :  { %289 = vmatpush.msra.mxu2 %v1091_v0  ;;  %312 = vmatpush.msrb.mxu3 %v1010_v8 }
  0x1e   :  { %432 = vmatpush.msrb.mxu1 %v1056_v54 }
  0x1f   :  { %290 = vmatpush.msra.mxu2 %v1019_v12  ;;  %313 = vmatpush.msrb.mxu3 %v1021_v13 }
  0x20   :  { %433 = vmatpush.msrb.mxu1 %v1067_v57 }
  0x21   :  { %291 = vmatpush.msra.mxu2 %v1027_v14  ;;  %497 = vmatpush.msra.mxu3 %v1060_v56 }
  0x22   :  { %434 = vmatpush.msrb.mxu1 %v1077_v60 }
  0x23   :  { %292 = vmatpush.msra.mxu2 %v1033_v15  ;;  %498 = vmatpush.msra.mxu3 %v1071_v59 }
  0x24   :  { %435 = vmatpush.msrb.mxu1 %v1089_v63 }
  0x25   :  { %293 = vmatpush.msra.mxu2 %v1036_v16  ;;  %499 = vmatpush.msra.mxu3 %v1083_v62 }
  0x26   :  { %436 = vmatpush.msrb.mxu1 %v1096_v1 }
  0x27   :  { %477 = vmatpush.msrb.mxu2 %v1058_v55  ;;  %500 = vmatpush.msra.mxu3 %v1100_v2 }
  0x28   :  { %437 = vmatpush.msrb.mxu1 %v1105_v3 }
  0x29   :  { %478 = vmatpush.msrb.mxu2 %v1069_v58  ;;  %501 = vmatpush.msra.mxu3 %v1005_v4 }
  0x2a   :  { %438 = vmatpush.msrb.mxu1 %v1114_v5 }
  0x2b   :  { %479 = vmatpush.msrb.mxu2 %v1079_v61  ;;  %502 = vmatpush.msra.mxu3 %v1008_v7 }
  0x2c   :  { %439 = vmatpush.msrb.mxu1 %v1123_v6 }
  0x2d   :  { %480 = vmatpush.msrb.mxu2 %v1091_v0  ;;  %503 = vmatpush.msra.mxu3 %v1010_v8 }
  0x2f   :  { %481 = vmatpush.msrb.mxu2 %v1019_v12  ;;  %504 = vmatpush.msra.mxu3 %v1021_v13 }
  0x31   :  { %482 = vmatpush.msrb.mxu2 %v1027_v14 }
  0x33   :  { %483 = vmatpush.msrb.mxu2 %v1033_v15 }
  0x35   :  { %484 = vmatpush.msrb.mxu2 %v1036_v16 }
  0x8b   :  { %v94_v19 = vpop.f32.mrf.mxu0 }
  0x8c   :  { %v1042_v20 = vadd.f32 %v94_v19, %v69_v18 }
  0x8e   :  { %v840_v21 = vmul.f32 -1.442695, %v1042_v20 }
  0x90   :  { %873 = vpow2.f32 %v840_v21 }
  0x91   :  { %v114_v23 = vpop.f32.mrf.mxu2 }
  0x92   :  { %v1045_v24 = vadd.f32 %v114_v23, %v70_v22 }
  0x94   :  { %v841_v25 = vmul.f32 -1.442695, %v1045_v24 }
  0x96   :  { %v874_v26 = vpop.eup %873  ;;  %875 = vpow2.f32 %v841_v25 }
  0x97   :  { %v185_v27 = vadd.f32 1.0, %v874_v26 }
  0x99   :  { %877 = vrcp.f32 %v185_v27  ;;  %vm192_vm2 = vweird.f32 %v185_v27  ;;  %v198_v42 = vand.u32 2147483648, %v185_v27  ;;  %v196_v44 = vand.u32 2147483647, %v185_v27 }
  0x9b   :  { %v199_v49 = vor.u32 1.1754944e-38, %v198_v42  ;;  %vm197_vm8 = vcmp.eq.f32.partialorder %v196_v44, 8.507059e+37 }
  0x9c   :  { %v876_v28 = vpop.eup %875 }
  0x9d   :  { %v186_v29 = vadd.f32 1.0, %v876_v28 }
  0x9f   :  { %v878_v30 = vpop.eup %877  ;;  %879 = vrcp.f32 %v186_v29  ;;  %v213_v37 = vand.u32 2147483648, %v186_v29  ;;  %v211_v39 = vand.u32 2147483647, %v186_v29  ;;  %vm207_vm4 = vweird.f32 %v186_v29 }
  0xa0   :  { %v188_v31 = vmul.f32 %v878_v30, %v185_v27  ;;  %vm193_vm3 = vweird.f32 %v878_v30 }
  0xa1   :  { %v214_v43 = vor.u32 1.1754944e-38, %v213_v37  ;;  %vm212_vm6 = vcmp.eq.f32.partialorder %v211_v39, 8.507059e+37  ;;  %vm194_vm7 = vmor %vm192_vm2, %vm193_vm3 }
  0xa2   :  { %v189_v32 = vsub.f32 1.0, %v188_v31 }
  0xa4   :  { %v190_v35 = vmul.f32 %v878_v30, %v189_v32 }
  0xa5   :  { %v880_v33 = vpop.eup %879 }
  0xa6   :  { %v203_v34 = vmul.f32 %v880_v33, %v186_v29  ;;  %vm208_vm1 = vweird.f32 %v880_v33  ;;  %v191_v40 = vadd.f32 %v878_v30, %v190_v35  ;;  %v154_v35 = vpop.f32.mrf.mxu3 }
  0xa7   :  { %vm209_vm5 = vmor %vm207_vm4, %vm208_vm1 }
  0xa8   :  { %v204_v36 = vsub.f32 1.0, %v203_v34  ;;  %v195_v47 = vsel %vm194_vm7, %v878_v30, %v191_v40  ;;  %v134_v34 = vpop.f32.mrf.mxu2 }
  0xa9   :  { %v200_v51 = vsel %vm197_vm8, %v199_v49, %v195_v47  ;;  %v1208_v37 = vadd.f32 %v134_v34, %v1042_v20 }
  0xaa   :  { %v205_v38 = vmul.f32 %v880_v33, %v204_v36 }
  0xac   :  { %v206_v41 = vadd.f32 %v880_v33, %v205_v38 }
  0xae   :  { %v210_v45 = vsel %vm209_vm5, %v880_v33, %v206_v41 }
  0xaf   :  { %v1048_v46 = vsel %vm212_vm6, %v214_v43, %v210_v45  ;;  %v1212_v43 = vadd.f32 %v154_v35, %v1045_v24 }
  0xb0   :  { %v217_v48 = vmul.f32 2.0, %v1048_v46 }
  0xb2   :  { %v842_v50 = vadd.f32 -1.0, %v217_v48 }
  0xb4   :  { %v219_v52 = vmul.f32 %v842_v50, %v200_v51 }
  0xb6   :  { %407 = vrot.lane.b32.xlu2 %v219_v52, %s980_s0  ;;  %881 = vtanh.f32 %v219_v52 }
  0xbc   :  { %v882_v53 = vpop.eup %881 }
  0xbd   :  { %222 = vrot.lane.b32.xlu0 %v882_v53, %s980_s0 }
 0x12f   :  { %v223_v9 = vpop.permute.xlu0 %222 }
 0x130   :  { %v225_v10 = vmul.f32 %v223_v9, %v1048_v46 }
 0x132   :  { %227 = vrot.lane.b32.xlu0 %v225_v10, %s980_s0 }
 0x1a4   :  { %v228_v11 = vpop.permute.xlu0 %227 }
 0x1a5   :  { %843 = vmatmul.msk.f32.vlgmr.msra.gmra.mxu1 %vm229_vm9, %v228_v11  ;;  %844 = vmatmul.msk.f32.vlgmr.msra.gmra.mxu2 %vm229_vm9, %v228_v11 }
 0x1a6   :  { %845 = vmatmul.msk.f32.vlgmr.msrb.gmra.mxu3 %vm229_vm9, %v228_v11  ;;  %618 = vmatpush.msra.mxu1 %v1056_v54 }
 0x1a7   :  { %663 = vmatpush.msra.mxu2 %v1058_v55  ;;  %683 = vmatpush.msrb.mxu3 %v1060_v56 }
 0x1a8   :  { %619 = vmatpush.msra.mxu1 %v1067_v57 }
 0x1a9   :  { %664 = vmatpush.msra.mxu2 %v1069_v58  ;;  %684 = vmatpush.msrb.mxu3 %v1071_v59 }
 0x1aa   :  { %620 = vmatpush.msra.mxu1 %v1077_v60 }
 0x1ab   :  { %665 = vmatpush.msra.mxu2 %v1079_v61  ;;  %685 = vmatpush.msrb.mxu3 %v1083_v62 }
 0x1ac   :  { %621 = vmatpush.msra.mxu1 %v1089_v63 }
 0x1ad   :  { %666 = vmatpush.msra.mxu2 %v1091_v0  ;;  %686 = vmatpush.msrb.mxu3 %v1100_v2 }
 0x1ae   :  { %622 = vmatpush.msra.mxu1 %v1096_v1 }
 0x1af   :  { %667 = vmatpush.msra.mxu2 %v1019_v12  ;;  %687 = vmatpush.msrb.mxu3 %v1005_v4  ;;  %v1192_v12 = vpop.f32.mrf.mxu0 }
 0x1b0   :  { %623 = vmatpush.msra.mxu1 %v1105_v3 }
 0x1b1   :  { %668 = vmatpush.msra.mxu2 %v1027_v14  ;;  %688 = vmatpush.msrb.mxu3 %v1008_v7 }
 0x1b2   :  { %624 = vmatpush.msra.mxu1 %v1114_v5 }
 0x1b3   :  { %669 = vmatpush.msra.mxu2 %v1033_v15  ;;  %689 = vmatpush.msrb.mxu3 %v1010_v8 }
 0x1b4   :  { %625 = vmatpush.msra.mxu1 %v1123_v6 }
 0x1b5   :  { %670 = vmatpush.msra.mxu2 %v1036_v16  ;;  %690 = vmatpush.msrb.mxu3 %v1021_v13  ;;  %v1197_v16 = vld [vmem:[#allocation2 + $0xc0] sm:$0xff]  ;;  %v1200_v13 = vld [vmem:[#allocation2 + $0xc8] sm:$0xff] }
 0x1b6   :  { %339 = vmatpush.msra.mxu0 %v1197_v16 }
 0x1b8   :  { %359 = vmatpush.msrb.mxu0 %v1200_v13 }
 0x222   :  { %v249_v4 = vpop.f32.mrf.mxu1 }
 0x223   :  { %v252_v14 = vadd.f32 %v249_v4, %v1192_v12 }
 0x225   :  { %v254_v7 = vsel %vm253_vm10, %v252_v14, -inf }
 0x226   :  { %255 = vmax.xlane.f32.xlu1 %v254_v7 }
 0x228   :  { %v295_v36 = vpop.f32.mrf.mxu2 }
 0x229   :  { %v318_v38 = vadd.f32 %v295_v36, %v1208_v37  ;;  %v315_v42 = vpop.f32.mrf.mxu3 }
 0x22a   :  { %v319_v44 = vadd.f32 %v315_v42, %v1212_v43 }
 0x299   :  { %v256_v17 = vpop.xlane.xlu1 %255 }
 0x29a   :  { %v257_v18 = vsub.f32 %v252_v14, %v256_v17 }
 0x29c   :  { %v258_v15 = vmul.f32 1.442695, %v257_v18 }
 0x29e   :  { %883 = vpow2.f32 %v258_v15 }
 0x2a4   :  { %v884_v8 = vpop.eup %883 }
 0x2a5   :  { %v260_v19 = vsel %vm253_vm10, %v884_v8, 0.0 }
 0x2a6   :  { %261 = vadd.xlane.f32.xlu1 %v260_v19 }
 0x319   :  { %v262_v21 = vpop.xlane.xlu1 %261 }
 0x31a   :  { %885 = vrcp.f32 %v262_v21  ;;  %v274_v26 = vand.u32 2147483648, %v262_v21  ;;  %v272_v28 = vand.u32 2147483647, %v262_v21  ;;  %vm268_vm12 = vweird.f32 %v262_v21 }
 0x31c   :  { %v275_v30 = vor.u32 1.1754944e-38, %v274_v26  ;;  %vm273_vm14 = vcmp.eq.f32.partialorder %v272_v28, 8.507059e+37 }
 0x320   :  { %v886_v22 = vpop.eup %885 }
 0x321   :  { %v264_v23 = vmul.f32 %v886_v22, %v262_v21  ;;  %vm269_vm11 = vweird.f32 %v886_v22  ;;  %v408_v21 = vpop.permute.xlu2 %407 }
 0x322   :  { %vm270_vm13 = vmor %vm268_vm12, %vm269_vm11 }
 0x323   :  { %v265_v25 = vsub.f32 1.0, %v264_v23 }
 0x325   :  { %v266_v27 = vmul.f32 %v886_v22, %v265_v25 }
 0x327   :  { %v267_v29 = vadd.f32 %v886_v22, %v266_v27 }
 0x329   :  { %v271_v31 = vsel %vm270_vm13, %v886_v22, %v267_v29 }
 0x32a   :  { %v276_v32 = vsel %vm273_vm14, %v275_v30, %v271_v31 }
 0x32b   :  { %v277_v33 = vmul.f32 %v884_v8, %v276_v32 }
 0x32d   :  { %846 = vmatmul.msk.f32.vlgmr.msra.gmra.mxu0 %vm320_vm15, %v277_v33 }
 0x32e   :  { %529 = vmatpush.msra.mxu0 %v1197_v16 }
 0x335   :  { %847 = vmatmul.msk.f32.vlgmr.msrb.gmra.mxu0 %vm320_vm15, %v277_v33 }
 0x336   :  { %549 = vmatpush.msrb.mxu0 %v1200_v13 }
 0x3aa   :  { %v341_v39 = vpop.f32.mrf.mxu0 }
 0x3ab   :  { %v364_v40 = vadd.f32 %v341_v39, %v318_v38 }
 0x3ad   :  { %v848_v41 = vmul.f32 -1.442695, %v364_v40 }
 0x3af   :  { %887 = vpow2.f32 %v848_v41 }
 0x3b2   :  { %v361_v45 = vpop.f32.mrf.mxu0 }
 0x3b3   :  { %v365_v46 = vadd.f32 %v361_v45, %v319_v44 }
 0x3b5   :  { %v888_v47 = vpop.eup %887  ;;  %v849_v48 = vmul.f32 -1.442695, %v365_v46 }
 0x3b6   :  { %v372_v49 = vadd.f32 1.0, %v888_v47 }
 0x3b7   :  { %889 = vpow2.f32 %v849_v48 }
 0x3b8   :  { %891 = vrcp.f32 %v372_v49  ;;  %v385_v9 = vand.u32 2147483648, %v372_v49  ;;  %vm379_vm4 = vweird.f32 %v372_v49  ;;  %v383_v11 = vand.u32 2147483647, %v372_v49 }
 0x3ba   :  { %v386_v18 = vor.u32 1.1754944e-38, %v385_v9  ;;  %vm384_vm7 = vcmp.eq.f32.partialorder %v383_v11, 8.507059e+37 }
 0x3bd   :  { %v890_v20 = vpop.eup %889 }
 0x3be   :  { %v892_v50 = vpop.eup %891  ;;  %v373_v51 = vadd.f32 1.0, %v890_v20 }
 0x3bf   :  { %v375_v52 = vmul.f32 %v892_v50, %v372_v49  ;;  %vm380_vm1 = vweird.f32 %v892_v50 }
 0x3c0   :  { %893 = vrcp.f32 %v373_v51  ;;  %v400_v59 = vand.u32 2147483648, %v373_v51  ;;  %v398_v62 = vand.u32 2147483647, %v373_v51  ;;  %vm394_vm2 = vweird.f32 %v373_v51  ;;  %vm381_vm6 = vmor %vm379_vm4, %vm380_vm1 }
 0x3c1   :  { %v376_v53 = vsub.f32 1.0, %v375_v52 }
 0x3c2   :  { %v401_v10 = vor.u32 1.1754944e-38, %v400_v59  ;;  %vm399_vm5 = vcmp.eq.f32.partialorder %v398_v62, 8.507059e+37 }
 0x3c3   :  { %v377_v58 = vmul.f32 %v892_v50, %v376_v53 }
 0x3c5   :  { %v378_v0 = vadd.f32 %v892_v50, %v377_v58 }
 0x3c6   :  { %v894_v55 = vpop.eup %893 }
 0x3c7   :  { %v390_v56 = vmul.f32 %v894_v55, %v373_v51  ;;  %vm395_vm0 = vweird.f32 %v894_v55  ;;  %v382_v7 = vsel %vm381_vm6, %v892_v50, %v378_v0 }
 0x3c8   :  { %vm396_vm3 = vmor %vm394_vm2, %vm395_vm0  ;;  %v387_v8 = vsel %vm384_vm7, %v386_v18, %v382_v7 }
 0x3c9   :  { %v391_v24 = vsub.f32 1.0, %v390_v56  ;;  %v410_v22 = vmul.f32 %v408_v21, %v387_v8 }
 0x3cb   :  { %v392_v61 = vmul.f32 %v894_v55, %v391_v24 }
 0x3cd   :  { %v393_v2 = vadd.f32 %v894_v55, %v392_v61 }
 0x3cf   :  { %v397_v4 = vsel %vm396_vm3, %v894_v55, %v393_v2 }
 0x3d0   :  { %v402_v14 = vsel %vm399_vm5, %v401_v10, %v397_v4 }
 0x3d1   :  { %v404_v17 = vmul.f32 2.0, %v402_v14 }
 0x3d3   :  { %v850_v15 = vadd.f32 -1.0, %v404_v17 }
 0x3d5   :  { %v411_v19 = vmul.f32 %v850_v15, %v387_v8 }
 0x3d7   :  { %413 = vrot.lane.b32.xlu2 %v411_v19, %s980_s0 }
 0x431   :  { %v414_v23 = vpop.permute.xlu2 %413 }
 0x432   :  { %v1216_v25 = vadd.f32 %v414_v23, %v410_v22 }
 0x434   :  { %895 = vtanh.f32 %v1216_v25 }
 0x43a   :  { %v896_v26 = vpop.eup %895 }
 0x43b   :  { %v418_v27 = vmul.f32 %v896_v26, %v402_v14 }
 0x43d   :  { %420 = vrot.lane.b32.xlu0 %v418_v27, %s980_s0 }
 0x4af   :  { %v421_v28 = vpop.permute.xlu0 %420 }
 0x4b0   :  { %851 = vmatmul.msk.f32.vlgmr.msrb.gmra.mxu1 %vm229_vm9, %v421_v28  ;;  %852 = vmatmul.msk.f32.vlgmr.msrb.gmra.mxu2 %vm229_vm9, %v421_v28 }
 0x4b1   :  { %853 = vmatmul.msk.f32.vlgmr.msra.gmra.mxu3 %vm229_vm9, %v421_v28  ;;  %804 = vmatpush.msrb.mxu1 %v1056_v54 }
 0x4b3   :  { %805 = vmatpush.msrb.mxu1 %v1067_v57 }
 0x4b5   :  { %806 = vmatpush.msrb.mxu1 %v1077_v60 }
 0x4b7   :  { %807 = vmatpush.msrb.mxu1 %v1089_v63 }
 0x4b9   :  { %808 = vmatpush.msrb.mxu1 %v1096_v1 }
 0x4bb   :  { %809 = vmatpush.msrb.mxu1 %v1105_v3 }
 0x4bd   :  { %810 = vmatpush.msrb.mxu1 %v1114_v5 }
 0x4bf   :  { %811 = vmatpush.msrb.mxu1 %v1123_v6 }
 0x52d   :  { %v441_v29 = vpop.f32.mrf.mxu1 }
 0x52e   :  { %v444_v30 = vadd.f32 %v441_v29, %v1192_v12 }
 0x530   :  { %v445_v31 = vsel %vm253_vm10, %v444_v30, -inf }
 0x531   :  { %446 = vmax.xlane.f32.xlu1 %v445_v31 }
 0x533   :  { %v486_v42 = vpop.f32.mrf.mxu2 }
 0x534   :  { %v509_v44 = vadd.f32 %v486_v42, %v1208_v37  ;;  %v506_v48 = vpop.f32.mrf.mxu3 }
 0x535   :  { %v510_v49 = vadd.f32 %v506_v48, %v1212_v43 }
 0x5a4   :  { %v447_v54 = vpop.xlane.xlu1 %446 }
 0x5a5   :  { %v448_v57 = vsub.f32 %v444_v30, %v447_v54 }
 0x5a7   :  { %v449_v32 = vmul.f32 1.442695, %v448_v57 }
 0x5a9   :  { %897 = vpow2.f32 %v449_v32 }
 0x5af   :  { %v898_v60 = vpop.eup %897 }
 0x5b0   :  { %v451_v63 = vsel %vm253_vm10, %v898_v60, 0.0 }
 0x5b1   :  { %452 = vadd.xlane.f32.xlu2 %v451_v63 }
 0x624   :  { %v453_v1 = vpop.xlane.xlu2 %452 }
 0x625   :  { %899 = vrcp.f32 %v453_v1  ;;  %v465_v6 = vand.u32 2147483648, %v453_v1  ;;  %v463_v35 = vand.u32 2147483647, %v453_v1  ;;  %vm459_vm11 = vweird.f32 %v453_v1 }
 0x627   :  { %v466_v38 = vor.u32 1.1754944e-38, %v465_v6  ;;  %vm464_vm13 = vcmp.eq.f32.partialorder %v463_v35, 8.507059e+37 }
 0x62b   :  { %v900_v3 = vpop.eup %899 }
 0x62c   :  { %v455_v5 = vmul.f32 %v900_v3, %v453_v1  ;;  %vm460_vm8 = vweird.f32 %v900_v3 }
 0x62d   :  { %vm461_vm12 = vmor %vm459_vm11, %vm460_vm8 }
 0x62e   :  { %v456_v33 = vsub.f32 1.0, %v455_v5 }
 0x630   :  { %v457_v34 = vmul.f32 %v900_v3, %v456_v33 }
 0x632   :  { %v458_v36 = vadd.f32 %v900_v3, %v457_v34 }
 0x634   :  { %v462_v39 = vsel %vm461_vm12, %v900_v3, %v458_v36 }
 0x635   :  { %v467_v40 = vsel %vm464_vm13, %v466_v38, %v462_v39 }
 0x636   :  { %v468_v41 = vmul.f32 %v898_v60, %v467_v40 }
 0x638   :  { %854 = vmatmul.msk.f32.vlgmr.msra.gmra.mxu0 %vm320_vm15, %v468_v41 }
 0x639   :  { %715 = vmatpush.msra.mxu0 %v1197_v16 }
 0x640   :  { %855 = vmatmul.msk.f32.vlgmr.msrb.gmra.mxu0 %vm320_vm15, %v468_v41 }
 0x641   :  { %735 = vmatpush.msrb.mxu0 %v1200_v13 }
 0x6b5   :  { %v531_v45 = vpop.f32.mrf.mxu0 }
 0x6b6   :  { %v554_v46 = vadd.f32 %v531_v45, %v509_v44 }
 0x6b8   :  { %v856_v47 = vmul.f32 -1.442695, %v554_v46 }
 0x6ba   :  { %901 = vpow2.f32 %v856_v47 }
 0x6bd   :  { %v551_v20 = vpop.f32.mrf.mxu0 }
 0x6be   :  { %v555_v50 = vadd.f32 %v551_v20, %v510_v49 }
 0x6c0   :  { %v902_v51 = vpop.eup %901  ;;  %v857_v52 = vmul.f32 -1.442695, %v555_v50 }
 0x6c1   :  { %v562_v53 = vadd.f32 1.0, %v902_v51 }
 0x6c2   :  { %903 = vpow2.f32 %v857_v52 }
 0x6c3   :  { %905 = vrcp.f32 %v562_v53  ;;  %v575_v4 = vand.u32 2147483648, %v562_v53  ;;  %vm569_vm3 = vweird.f32 %v562_v53  ;;  %v573_v7 = vand.u32 2147483647, %v562_v53 }
 0x6c5   :  { %v576_v19 = vor.u32 1.1754944e-38, %v575_v4  ;;  %vm574_vm6 = vcmp.eq.f32.partialorder %v573_v7, 8.507059e+37 }
 0x6c8   :  { %v904_v16 = vpop.eup %903 }
 0x6c9   :  { %v906_v55 = vpop.eup %905  ;;  %v563_v13 = vadd.f32 1.0, %v904_v16 }
 0x6ca   :  { %v565_v56 = vmul.f32 %v906_v55, %v562_v53  ;;  %vm570_vm0 = vweird.f32 %v906_v55 }
 0x6cb   :  { %907 = vrcp.f32 %v563_v13  ;;  %v590_v0 = vand.u32 2147483648, %v563_v13  ;;  %v588_v9 = vand.u32 2147483647, %v563_v13  ;;  %vm584_vm1 = vweird.f32 %v563_v13  ;;  %vm571_vm5 = vmor %vm569_vm3, %vm570_vm0 }
 0x6cc   :  { %v566_v24 = vsub.f32 1.0, %v565_v56 }
 0x6cd   :  { %v591_v14 = vor.u32 1.1754944e-38, %v590_v0  ;;  %vm589_vm4 = vcmp.eq.f32.partialorder %v588_v9, 8.507059e+37 }
 0x6ce   :  { %v567_v62 = vmul.f32 %v906_v55, %v566_v24 }
 0x6d0   :  { %v568_v10 = vadd.f32 %v906_v55, %v567_v62 }
 0x6d1   :  { %v908_v58 = vpop.eup %907 }
 0x6d2   :  { %v580_v59 = vmul.f32 %v908_v58, %v563_v13  ;;  %vm585_vm14 = vweird.f32 %v908_v58  ;;  %v572_v15 = vsel %vm571_vm5, %v906_v55, %v568_v10 }
 0x6d3   :  { %vm586_vm2 = vmor %vm584_vm1, %vm585_vm14  ;;  %v577_v22 = vsel %vm574_vm6, %v576_v19, %v572_v15 }
 0x6d4   :  { %v581_v61 = vsub.f32 1.0, %v580_v59  ;;  %v596_v26 = vmul.f32 %v577_v22, %v1216_v25 }
 0x6d6   :  { %v582_v2 = vmul.f32 %v908_v58, %v581_v61 }
 0x6d8   :  { %v583_v11 = vadd.f32 %v908_v58, %v582_v2 }
 0x6da   :  { %v587_v17 = vsel %vm586_vm2, %v908_v58, %v583_v11 }
 0x6db   :  { %v592_v18 = vsel %vm589_vm4, %v591_v14, %v587_v17 }
 0x6dc   :  { %v594_v8 = vmul.f32 2.0, %v592_v18 }
 0x6de   :  { %v858_v21 = vadd.f32 -1.0, %v594_v8 }
 0x6e0   :  { %v597_v23 = vmul.f32 %v858_v21, %v577_v22 }
 0x6e2   :  { %599 = vrot.lane.b32.xlu0 %v597_v23, %s980_s0 }
 0x754   :  { %v600_v27 = vpop.permute.xlu0 %599 }
 0x755   :  { %v1242_v28 = vadd.f32 %v600_v27, %v596_v26 }
 0x757   :  { %909 = vtanh.f32 %v1242_v28 }
 0x75d   :  { %v910_v29 = vpop.eup %909 }
 0x75e   :  { %v604_v30 = vmul.f32 %v910_v29, %v592_v18 }
 0x760   :  { %606 = vrot.lane.b32.xlu1 %v604_v30, %s980_s0 }
 0x7d2   :  { %v607_v31 = vpop.permute.xlu1 %606 }
 0x7d3   :  { %859 = vmatmul.msk.f32.vlgmr.msra.gmra.mxu1 %vm229_vm9, %v607_v31  ;;  %860 = vmatmul.msk.f32.vlgmr.msra.gmra.mxu2 %vm229_vm9, %v607_v31 }
 0x7d4   :  { %861 = vmatmul.msk.f32.vlgmr.msrb.gmra.mxu3 %vm229_vm9, %v607_v31 }
 0x850   :  { %v627_v54 = vpop.f32.mrf.mxu1 }
 0x851   :  { %v630_v57 = vadd.f32 %v627_v54, %v1192_v12 }
 0x853   :  { %v631_v25 = vsel %vm253_vm10, %v630_v57, -inf }
 0x854   :  { %632 = vmax.xlane.f32.xlu0 %v631_v25 }
 0x856   :  { %v672_v45 = vpop.f32.mrf.mxu2 }
 0x857   :  { %v695_v46 = vadd.f32 %v672_v45, %v1208_v37  ;;  %v692_v20 = vpop.f32.mrf.mxu3 }
 0x858   :  { %v696_v50 = vadd.f32 %v692_v20, %v1212_v43 }
 0x8c7   :  { %v633_v32 = vpop.xlane.xlu0 %632 }
 0x8c8   :  { %v634_v60 = vsub.f32 %v630_v57, %v633_v32 }
 0x8ca   :  { %v635_v63 = vmul.f32 1.442695, %v634_v60 }
 0x8cc   :  { %911 = vpow2.f32 %v635_v63 }
 0x8d2   :  { %v912_v1 = vpop.eup %911 }
 0x8d3   :  { %v637_v3 = vsel %vm253_vm10, %v912_v1, 0.0 }
 0x8d4   :  { %638 = vadd.xlane.f32.xlu1 %v637_v3 }
 0x947   :  { %v639_v5 = vpop.xlane.xlu1 %638 }
 0x948   :  { %913 = vrcp.f32 %v639_v5  ;;  %v651_v35 = vand.u32 2147483648, %v639_v5  ;;  %v649_v38 = vand.u32 2147483647, %v639_v5  ;;  %vm645_vm8 = vweird.f32 %v639_v5 }
 0x94a   :  { %v652_v40 = vor.u32 1.1754944e-38, %v651_v35  ;;  %vm650_vm12 = vcmp.eq.f32.partialorder %v649_v38, 8.507059e+37 }
 0x94e   :  { %v914_v33 = vpop.eup %913 }
 0x94f   :  { %v641_v6 = vmul.f32 %v914_v33, %v639_v5  ;;  %vm646_vm7 = vweird.f32 %v914_v33 }
 0x950   :  { %vm647_vm11 = vmor %vm645_vm8, %vm646_vm7 }
 0x951   :  { %v642_v34 = vsub.f32 1.0, %v641_v6 }
 0x953   :  { %v643_v36 = vmul.f32 %v914_v33, %v642_v34 }
 0x955   :  { %v644_v39 = vadd.f32 %v914_v33, %v643_v36 }
 0x957   :  { %v648_v41 = vsel %vm647_vm11, %v914_v33, %v644_v39 }
 0x958   :  { %v653_v42 = vsel %vm650_vm12, %v652_v40, %v648_v41 }
 0x959   :  { %v654_v44 = vmul.f32 %v912_v1, %v653_v42 }
 0x95b   :  { %862 = vmatmul.msk.f32.vlgmr.msra.gmra.mxu0 %vm320_vm15, %v654_v44 }
 0x963   :  { %863 = vmatmul.msk.f32.vlgmr.msrb.gmra.mxu0 %vm320_vm15, %v654_v44 }
 0x9d8   :  { %v717_v47 = vpop.f32.mrf.mxu0 }
 0x9d9   :  { %v740_v48 = vadd.f32 %v717_v47, %v695_v46 }
 0x9db   :  { %v864_v49 = vmul.f32 -1.442695, %v740_v48 }
 0x9dd   :  { %915 = vpow2.f32 %v864_v49 }
 0x9e0   :  { %v737_v51 = vpop.f32.mrf.mxu0 }
 0x9e1   :  { %v741_v52 = vadd.f32 %v737_v51, %v696_v50 }
 0x9e3   :  { %v916_v53 = vpop.eup %915  ;;  %v865_v16 = vmul.f32 -1.442695, %v741_v52 }
 0x9e4   :  { %v748_v55 = vadd.f32 1.0, %v916_v53 }
 0x9e5   :  { %917 = vpow2.f32 %v865_v16 }
 0x9e6   :  { %919 = vrcp.f32 %v748_v55  ;;  %v761_v4 = vand.u32 2147483648, %v748_v55  ;;  %vm755_vm1 = vweird.f32 %v748_v55  ;;  %v759_v7 = vand.u32 2147483647, %v748_v55 }
 0x9e8   :  { %v762_v19 = vor.u32 1.1754944e-38, %v761_v4  ;;  %vm760_vm4 = vcmp.eq.f32.partialorder %v759_v7, 8.507059e+37 }
 0x9eb   :  { %v918_v13 = vpop.eup %917 }
 0x9ec   :  { %v920_v56 = vpop.eup %919  ;;  %v749_v24 = vadd.f32 1.0, %v918_v13 }
 0x9ed   :  { %v751_v58 = vmul.f32 %v920_v56, %v748_v55  ;;  %vm756_vm13 = vweird.f32 %v920_v56 }
 0x9ee   :  { %921 = vrcp.f32 %v749_v24  ;;  %v776_v2 = vand.u32 2147483648, %v749_v24  ;;  %v774_v43 = vand.u32 2147483647, %v749_v24  ;;  %vm770_vm14 = vweird.f32 %v749_v24  ;;  %vm757_vm3 = vmor %vm755_vm1, %vm756_vm13 }
 0x9ef   :  { %v752_v37 = vsub.f32 1.0, %v751_v58 }
 0x9f0   :  { %v777_v14 = vor.u32 1.1754944e-38, %v776_v2  ;;  %vm775_vm2 = vcmp.eq.f32.partialorder %v774_v43, 8.507059e+37 }
 0x9f1   :  { %v753_v0 = vmul.f32 %v920_v56, %v752_v37 }
 0x9f3   :  { %v754_v10 = vadd.f32 %v920_v56, %v753_v0 }
 0x9f4   :  { %v922_v59 = vpop.eup %921 }
 0x9f5   :  { %v766_v61 = vmul.f32 %v922_v59, %v749_v24  ;;  %vm771_vm15 = vweird.f32 %v922_v59  ;;  %v758_v15 = vsel %vm757_vm3, %v920_v56, %v754_v10 }
 0x9f6   :  { %vm772_vm0 = vmor %vm770_vm14, %vm771_vm15  ;;  %v763_v22 = vsel %vm760_vm4, %v762_v19, %v758_v15 }
 0x9f7   :  { %v767_v62 = vsub.f32 1.0, %v766_v61  ;;  %v782_v26 = vmul.f32 %v763_v22, %v1242_v28 }
 0x9f9   :  { %v768_v9 = vmul.f32 %v922_v59, %v767_v62 }
 0x9fb   :  { %v769_v11 = vadd.f32 %v922_v59, %v768_v9 }
 0x9fd   :  { %v773_v17 = vsel %vm772_vm0, %v922_v59, %v769_v11 }
 0x9fe   :  { %v778_v18 = vsel %vm775_vm2, %v777_v14, %v773_v17 }
 0x9ff   :  { %v780_v8 = vmul.f32 2.0, %v778_v18 }
 0xa01   :  { %v866_v21 = vadd.f32 -1.0, %v780_v8 }
 0xa03   :  { %v783_v23 = vmul.f32 %v866_v21, %v763_v22 }
 0xa05   :  { %785 = vrot.lane.b32.xlu2 %v783_v23, %s980_s0 }
 0xa5f   :  { %v786_v27 = vpop.permute.xlu2 %785 }
 0xa60   :  { %v788_v29 = vadd.f32 %v786_v27, %v782_v26 }
 0xa62   :  { %923 = vtanh.f32 %v788_v29 }
 0xa68   :  { %v924_v30 = vpop.eup %923 }
 0xa69   :  { %v790_v31 = vmul.f32 %v924_v30, %v778_v18 }
 0xa6b   :  { %792 = vrot.lane.b32.xlu0 %v790_v31, %s980_s0 }
 0xadd   :  { %v793_v54 = vpop.permute.xlu0 %792 }
 0xade   :  { %867 = vmatmul.msk.f32.vlgmr.msrb.gmra.mxu1 %vm229_vm9, %v793_v54 }
 0xb5b   :  { %v813_v57 = vpop.f32.mrf.mxu1 }
 0xb5c   :  { %v816_v25 = vadd.f32 %v813_v57, %v1192_v12 }
 0xb5e   :  { %817 = vst.msk [vmem:[#allocation5] sm:$0x3] %vm253_vm10, %v816_v25 }
 0xb5f   :  { %828 = dma.vmem_to_hbm [thread:$0]  %s824_s9, 32, %s826_s12, [#allocation4]  }
 0xb60   :  { %975 = dma.done.wait [#allocation4], 32  }
 0xb61   :  { %976 = vsyncadd [#allocation4], 4294967264 }
 0xb62   :  { %833 = vsyncpa [#allocation3], 1 }
 0xb63   :  { %834 = vsyncpa [#allocation4], 1 }

</bundles_post_ra>
